<compile_context>
chip_gen: v7x
topology: tpu7x:2x2x1
jax: 0.10.0
libtpu: 0.0.40
codegen_flags: <defaults>
</compile_context>

<pallas_src>
import jax
import jax.numpy as jnp
import numpy as np
from jax.experimental import pallas as pl
from jax.experimental.pallas import tpu as pltpu


# ---------------------------------------------------------------------------
# Kernel 1: video_embedding   y = vfeat @ W + b   (row-tiled, weight resident)
# ---------------------------------------------------------------------------
def _video_embed_kernel(v_ref, w_ref, b_ref, o_ref):
    v16 = v_ref[...].astype(jnp.bfloat16)          # cast in VMEM -> MXU-native
    w16 = w_ref[...].astype(jnp.bfloat16)
    acc = jnp.dot(v16, w16, preferred_element_type=jnp.float32)
    o_ref[...] = (acc + b_ref[...]).astype(o_ref.dtype)


def video_embed(vfeat, w, b, *, tm=256):
    B, T, F = vfeat.shape
    D = w.shape[1]
    BT = B * T
    v2 = vfeat.reshape(BT, F)
    tm = min(tm, BT)
    if tm < BT:
        tm = max(8, (tm // 8) * 8)                 # row tile must be a sublane multiple
    grid_m = pl.cdiv(BT, tm)
    out = pl.pallas_call(
        _video_embed_kernel,
        out_shape=jax.ShapeDtypeStruct((BT, D), vfeat.dtype),
        grid=(grid_m,),
        in_specs=[
            pl.BlockSpec((tm, F), lambda i: (i, 0)),
            pl.BlockSpec((F, D), lambda i: (0, 0)),     # weight DMA'd once, stays resident
            pl.BlockSpec((1, D), lambda i: (0, 0)),     # bias resident
        ],
        out_specs=pl.BlockSpec((tm, D), lambda i: (i, 0)),
        compiler_params=pltpu.CompilerParams(
            dimension_semantics=("parallel",),          # shards row tiles across TCs (v7x)
            vmem_limit_bytes=64 * 1024 * 1024,
        ),
        cost_estimate=pl.CostEstimate(
            flops=2 * BT * F * D,
            transcendentals=0,
            bytes_accessed=4 * (BT * F + F * D + BT * D),
        ),
    )(v2, w, b.reshape(1, D))
    return out.reshape(B, T, D)


# ---------------------------------------------------------------------------
# Kernel 2: fused per-depth [prompt ; vemb] concat + ResMLP
#   out = x + LayerNorm( ReLU(x @ W1 + b1) @ W2 + b2 )
# Grid iterates over depth; vemb has a constant index_map so it is DMA'd into
# VMEM once and re-used for every depth step; weights are indexed per depth.
# ---------------------------------------------------------------------------
def _prompt_resmlp_kernel(p_ref, v_ref, w1_ref, b1_ref, w2_ref, b2_ref,
                          g_ref, bt_ref, o_ref):
    B, T, D = v_ref.shape
    P = p_ref.shape[1]
    # Build the concatenated slab in VMEM/registers (never materialized in HBM).
    prompt = jnp.broadcast_to(p_ref[0][None], (B, P, D))           # (B, P, D) f32
    x = jnp.concatenate([prompt, v_ref[...]], axis=1)              # (B, P+T, D) f32
    xf = x.reshape(B * (P + T), D)                                 # (N, D) contiguous

    # Linear -> ReLU -> Linear   (bf16 MXU inputs, f32 accumulation)
    h = jnp.dot(xf.astype(jnp.bfloat16), w1_ref[0].astype(jnp.bfloat16),
                preferred_element_type=jnp.float32) + b1_ref[0]
    h = jnp.maximum(h, 0.0)
    y = jnp.dot(h.astype(jnp.bfloat16), w2_ref[0].astype(jnp.bfloat16),
                preferred_element_type=jnp.float32) + b2_ref[0]

    # LayerNorm (torch default eps=1e-5), single-pass statistics (one fewer
    # dependent cross-lane reduction on the XLU).
    inv_d = 1.0 / D
    mean = jnp.sum(y, axis=-1, keepdims=True) * inv_d
    meansq = jnp.sum(y * y, axis=-1, keepdims=True) * inv_d
    var = meansq - mean * mean
    yhat = (y - mean) * jax.lax.rsqrt(var + 1e-5)

    out = xf + yhat * g_ref[0] + bt_ref[0]                         # residual in f32
    o_ref[0] = out.reshape(B, P + T, D).astype(o_ref.dtype)        # one contiguous store


def prompt_resmlp(soft_prompt, vemb, w1, b1, w2, b2, gamma, beta):
    depth, P, D = soft_prompt.shape
    B, T, _ = vemb.shape
    BN = w1.shape[2]
    N = B * (P + T)
    return pl.pallas_call(
        _prompt_resmlp_kernel,
        out_shape=jax.ShapeDtypeStruct((depth, B, P + T, D), vemb.dtype),
        grid=(depth,),
        in_specs=[
            pl.BlockSpec((1, P, D), lambda i: (i, 0, 0)),      # prompt_i
            pl.BlockSpec((B, T, D), lambda i: (0, 0, 0)),      # vemb: resident across depth
            pl.BlockSpec((1, D, BN), lambda i: (i, 0, 0)),     # W1_i
            pl.BlockSpec((1, 1, BN), lambda i: (i, 0, 0)),     # b1_i
            pl.BlockSpec((1, BN, D), lambda i: (i, 0, 0)),     # W2_i
            pl.BlockSpec((1, 1, D), lambda i: (i, 0, 0)),      # b2_i
            pl.BlockSpec((1, 1, D), lambda i: (i, 0, 0)),      # LN gamma_i
            pl.BlockSpec((1, 1, D), lambda i: (i, 0, 0)),      # LN beta_i
        ],
        out_specs=pl.BlockSpec((1, B, P + T, D), lambda i: (i, 0, 0, 0)),
        compiler_params=pltpu.CompilerParams(
            dimension_semantics=("parallel",),  # shards the independent depth loop across TCs
            vmem_limit_bytes=64 * 1024 * 1024,
        ),
        cost_estimate=pl.CostEstimate(
            flops=4 * depth * N * D * BN,
            transcendentals=depth * N,
            bytes_accessed=4 * (depth * P * D + B * T * D
                                + depth * (D * BN + BN + BN * D + 3 * D)
                                + depth * N * D),
        ),
    )(soft_prompt, vemb, w1, b1, w2, b2, gamma, beta)


# ---------------------------------------------------------------------------
# Prompting.forward  -> stacked (depth, B, P+T, D); out[i] == torch list entry i.
# ---------------------------------------------------------------------------
def prompting_forward(params, vfeat):
    vemb = video_embed(vfeat, params["ve_w"], params["ve_b"])      # (B, T, D)
    return prompt_resmlp(params["soft_prompt"], vemb,
                         params["w1"], params["b1"], params["w2"], params["b2"],
                         params["gamma"], params["beta"])


# ---------------------------------------------------------------------------
# System.forward
# ---------------------------------------------------------------------------
def system_forward(params, x, vfeat, y_in):
    prompts_encoder = prompting_forward(params, vfeat)
    # TODO(synk): `self.model` (external Whisper encoder/decoder passed to __init__)
    # is not defined in the reference module, so
    # logits = model.decoder(y_in, model.encoder(x, prompts_encoder)) cannot be
    # reproduced; the Prompting output (the defined compute) is returned instead.
    del x, y_in
    return prompts_encoder


# ---------------------------------------------------------------------------
# Pure-JAX reference (mirrors the torch forward).  matmul_dtype=bfloat16 mirrors
# the kernel's MXU numerics; float32 mirrors the original torch module.
# ---------------------------------------------------------------------------
def reference_forward(params, vfeat, matmul_dtype=jnp.float32):
    def mm(a, b):
        return jnp.dot(a.astype(matmul_dtype), b.astype(matmul_dtype),
                       preferred_element_type=jnp.float32)

    B, T, F = vfeat.shape
    vemb = mm(vfeat.reshape(B * T, F), params["ve_w"]).reshape(B, T, -1) + params["ve_b"]
    sp = params["soft_prompt"]
    depth, P, D = sp.shape
    outs = []
    for i in range(depth):
        p = jnp.broadcast_to(sp[i][None], (B, P, D))
        xcat = jnp.concatenate([p, vemb], axis=1)                  # (B, P+T, D)
        h = jnp.maximum(mm(xcat, params["w1"][i]) + params["b1"][i], 0.0)
        y = mm(h, params["w2"][i]) + params["b2"][i]
        mean = jnp.mean(y, axis=-1, keepdims=True)
        var = jnp.mean(jnp.square(y - mean), axis=-1, keepdims=True)
        yhat = (y - mean) * jax.lax.rsqrt(var + 1e-5)
        outs.append(xcat + yhat * params["gamma"][i] + params["beta"][i])
    return outs


# ---------------------------------------------------------------------------
# Deterministic parameter init (shapes from Prompting/ResMLP __init__).
# ---------------------------------------------------------------------------
def init_params(key, dim, prompt_length, depth, vdim=1024):
    bn = dim // 2
    ks = jax.random.split(key, 7)

    def uni(k, shape, fan_in, fan_out, scale=1.0):
        lim = scale * (6.0 / (fan_in + fan_out)) ** 0.5
        return jax.random.uniform(k, shape, jnp.float32, -lim, lim)

    return {
        "ve_w": uni(ks[0], (vdim, dim), vdim, dim),
        "ve_b": uni(ks[1], (dim,), vdim, dim, 0.1),
        "soft_prompt": uni(ks[2], (depth, prompt_length, dim), prompt_length, dim),
        "w1": uni(ks[3], (depth, dim, bn), dim, bn),
        "b1": uni(ks[4], (depth, 1, bn), dim, bn, 0.1),
        "w2": uni(ks[5], (depth, bn, dim), bn, dim),
        "b2": uni(ks[6], (depth, 1, dim), bn, dim, 0.1),
        "gamma": jnp.ones((depth, 1, dim), jnp.float32),
        "beta": jnp.zeros((depth, 1, dim), jnp.float32),
    }


if __name__ == "__main__":
    # Small shapes consistent with the module.  DIM is kept a multiple of 128 so
    # output stores are lane-dense (Whisper text dims 384/512/768/1024/1280 all
    # satisfy this in the real model).
    DIM, PROMPT_LEN, DEPTH = 256, 8, 4
    B, T_VID, VDIM = 2, 8, 1024

    key = jax.random.PRNGKey(0)
    kp, kx, kv, ky = jax.random.split(key, 4)
    params = init_params(kp, DIM, PROMPT_LEN, DEPTH, VDIM)

    x = jax.random.normal(kx, (B, 80, 16), jnp.float32)        # mel-like encoder input (unused, see TODO)
    vfeat = jax.random.normal(kv, (B, T_VID, VDIM), jnp.float32)
    y_in = jax.random.randint(ky, (B, 8), 0, 100, jnp.int32)   # decoder tokens (unused, see TODO)

    out = jax.block_until_ready(system_forward(params, x, vfeat, y_in))
    assert out.shape == (DEPTH, B, PROMPT_LEN + T_VID, DIM)

    # Tight check vs a reference that mirrors the kernel's bf16-matmul numerics.
    ref16 = reference_forward(params, vfeat, matmul_dtype=jnp.bfloat16)
    for i in range(DEPTH):
        np.testing.assert_allclose(np.asarray(out[i]), np.asarray(ref16[i]),
                                   atol=2e-3, rtol=2e-3)

    # Loose sanity check vs the full-f32 reference (original torch semantics).
    ref32 = reference_forward(params, vfeat, matmul_dtype=jnp.float32)
    for i in range(DEPTH):
        np.testing.assert_allclose(np.asarray(out[i]), np.asarray(ref32[i]),
                                   atol=2e-1, rtol=2e-1)

    print("KERNEL_OK")
</pallas_src>

<mosaic_0001>
module attributes {stable_mosaic.version = 11 : i64} {
  func.func @_video_embed_kernel(%arg0: i32, %arg1: memref<16x1024xf32, #tpu.memory_space<vmem>>, %arg2: memref<1024x256xf32, #tpu.memory_space<vmem>>, %arg3: memref<1x256xf32, #tpu.memory_space<vmem>>, %arg4: memref<16x256xf32, #tpu.memory_space<vmem>>) attributes {dimension_semantics = [#tpu.dimension_semantics<parallel>], iteration_bounds = array<i64: 1>, scalar_prefetch = 0 : i64, scratch_operands = 0 : i64, tpu.core_type = #tpu.core_type<tc>, window_params = [{transform_indices = @transform_0, window_bounds = array<i64: 16, 1024>}, {pipeline_mode = #tpu.pipeline_mode<synchronous>, transform_indices = @transform_1, window_bounds = array<i64: 1024, 256>}, {pipeline_mode = #tpu.pipeline_mode<synchronous>, transform_indices = @transform_2, window_bounds = array<i64: 1, 256>}, {transform_indices = @transform_3, window_bounds = array<i64: 16, 256>}]} {
    %c0 = arith.constant 0 : index
    %c0_0 = arith.constant 0 : index
    %0 = vector.load %arg1[%c0, %c0_0] : memref<16x1024xf32, #tpu.memory_space<vmem>>, vector<16x1024xf32>
    %1 = arith.truncf %0 : vector<16x1024xf32> to vector<16x1024xbf16>
    %c0_1 = arith.constant 0 : index
    %c0_2 = arith.constant 0 : index
    %2 = vector.load %arg2[%c0_1, %c0_2] : memref<1024x256xf32, #tpu.memory_space<vmem>>, vector<1024x256xf32>
    %3 = arith.truncf %2 : vector<1024x256xf32> to vector<1024x256xbf16>
    %cst = arith.constant dense<0.000000e+00> : vector<16x256xf32>
    %4 = tpu.matmul %1, %3, %cst {dimension_numbers = #tpu.dot_dimension_numbers<[1], [0], [0], [1], [0, 0, 1, 1], [], []>} : vector<16x1024xbf16>, vector<1024x256xbf16>, vector<16x256xf32> -> vector<16x256xf32>
    %c0_3 = arith.constant 0 : index
    %c0_4 = arith.constant 0 : index
    %5 = vector.load %arg3[%c0_3, %c0_4] : memref<1x256xf32, #tpu.memory_space<vmem>>, vector<1x256xf32>
    %6 = vector.broadcast %5 : vector<1x256xf32> to vector<16x256xf32>
    %7 = arith.addf %4, %6 : vector<16x256xf32>
    %c0_5 = arith.constant 0 : index
    %c0_6 = arith.constant 0 : index
    %8 = vector.load %arg4[%c0_5, %c0_6] : memref<16x256xf32, #tpu.memory_space<vmem>>, vector<16x256xf32>
    tpu.vector_store %arg4[%c0_5, %c0_6], %7 {strides = array<i32>} : memref<16x256xf32, #tpu.memory_space<vmem>>, vector<16x256xf32>,
    return
  }
  func.func @transform_0(%arg0: i32) -> (i32, i32) {
    %c0_i32 = arith.constant 0 : i32
    %c0_i32_0 = arith.constant 0 : i32
    return %arg0, %c0_i32 : i32, i32
  }
  func.func @transform_1(%arg0: i32) -> (i32, i32) {
    %c0_i32 = arith.constant 0 : i32
    %c0_i32_0 = arith.constant 0 : i32
    %c0_i32_1 = arith.constant 0 : i32
    return %c0_i32, %c0_i32_0 : i32, i32
  }
  func.func @transform_2(%arg0: i32) -> (i32, i32) {
    %c0_i32 = arith.constant 0 : i32
    %c0_i32_0 = arith.constant 0 : i32
    %c0_i32_1 = arith.constant 0 : i32
    return %c0_i32, %c0_i32_0 : i32, i32
  }
  func.func @transform_3(%arg0: i32) -> (i32, i32) {
    %c0_i32 = arith.constant 0 : i32
    %c0_i32_0 = arith.constant 0 : i32
    return %arg0, %c0_i32 : i32, i32
  }
}

</mosaic_0001>

<bundles_post_ra>
// kernel: tpu_custom_call.1
= control target key start
LH: loop header
LB: loop body
LE: loop exit
PB: predicated region body
PF: predicated region fallthrough
CT: control target
= control target key end

     0   :  { %8 = vsyncpa [#allocation3], 0  ;;  %s868_s0 = inlined_call_operand.hbm [shape: f32[16,1024], index: 0, kind: input, shape index: {}]   ;;  %s869_s1 = inlined_call_operand.hbm [shape: f32[1024,256], index: 1, kind: input, shape index: {}]   ;;  %s870_s2 = inlined_call_operand.hbm [shape: f32[1,256], index: 2, kind: input, shape index: {}]   ;;  %s871_s3 = inlined_call_operand.hbm [shape: f32[16,256], index: 3, kind: output, shape index: {}]  }
   0x1   :  { %9 = vsyncpa [#allocation6], 0 }
   0x2   :  { %10 = vsyncpa [#allocation4], 0  ;;  %s786_s12 = smov [#allocation5]   ;;  %s692_s16 = scalar_lea.hbm %s869_s1, 32768 }
   0x3   :  { %s28_s13 = sshll.u32 %s786_s12, 4  ;;  %p693_p0 = scmp.ne.s32.totalorder %s869_s1, %s692_s16  ;;  %s29_s13 = int_to_ptr.vmem [resolvable:$true] %s28_s13 }
   0x4   :  { %p696_p1 = scmp.lt.u32.totalorder %s692_s16, %s869_s1 }
   0x6   :  { %p698_p2 = pnand %p696_p1, %p693_p0 }
   0x8   :  { %701 = shalt.err (!%p698_p2)
}
   0x9   :  { %s702_s21 = scalar_lea.vmem %s29_s13, 32768  ;;  %p707_p4 = scmp.lt.s32.totalorder %s29_s13, %s29_s13 }
   0xa   :  { %p703_p3 = scmp.ne.s32.totalorder %s29_s13, %s702_s21  ;;  %p708_p5 = scmp.lt.s32.totalorder %s702_s21, %s702_s21 }
   0xc   :  { %p709_p6 = por %p708_p5, %p707_p4 }
   0xe   :  { %p710_p7 = pnand %p709_p6, %p703_p3 }
  0x10   :  { %713 = shalt.err (!%p710_p7)
}
  0x11   :  { %s787_s22 = smov 256   ;;  %s788_s23 = smov 16  }
  0x12   :  { %34 = dma.hbm_to_vmem [thread:$0]  %s869_s1, 32768, %s29_s13, [#allocation6], %s787_s22, %s787_s22, %s788_s23  }
  0x13   :  { %s789_s26 = smov [#allocation2]   ;;  %s714_s30 = scalar_lea.hbm %s868_s0, 2048 }
  0x14   :  { %s16_s27 = sshll.u32 %s789_s26, 4  ;;  %p715_p8 = scmp.ne.s32.totalorder %s868_s0, %s714_s30  ;;  %s17_s27 = int_to_ptr.vmem [resolvable:$true] %s16_s27 }
  0x15   :  { %p718_p9 = scmp.lt.u32.totalorder %s714_s30, %s868_s0 }
  0x17   :  { %p720_p10 = pnand %p718_p9, %p715_p8 }
  0x19   :  { %723 = shalt.err (!%p720_p10)
}
  0x1a   :  { %s724_s8 = scalar_lea.vmem %s17_s27, 2048  ;;  %p729_p12 = scmp.lt.s32.totalorder %s17_s27, %s17_s27 }
  0x1b   :  { %p725_p11 = scmp.ne.s32.totalorder %s17_s27, %s724_s8  ;;  %p730_p13 = scmp.lt.s32.totalorder %s724_s8, %s724_s8 }
  0x1d   :  { %p731_p0 = por %p730_p13, %p729_p12 }
  0x1f   :  { %p732_p1 = pnand %p731_p0, %p725_p11 }
  0x21   :  { %735 = shalt.err (!%p732_p1)
}
  0x22   :  { %s790_s1 = smov 1024   ;;  %s791_s9 = smov 64  }
  0x23   :  { %22 = dma.hbm_to_vmem [thread:$0]  %s868_s0, 2048, %s17_s27, [#allocation3], %s790_s1, %s790_s1, %s791_s9  }
  0x24   :  { %s792_s12 = smov [#allocation7]   ;;  %s736_s16 = scalar_lea.hbm %s870_s2, 32 }
  0x25   :  { %s41_s13 = sshll.u32 %s792_s12, 4  ;;  %p737_p2 = scmp.ne.s32.totalorder %s870_s2, %s736_s16  ;;  %s42_s13 = int_to_ptr.vmem [resolvable:$true] %s41_s13 }
  0x26   :  { %p740_p3 = scmp.lt.u32.totalorder %s736_s16, %s870_s2 }
  0x28   :  { %p742_p4 = pnand %p740_p3, %p737_p2 }
  0x2a   :  { %745 = shalt.err (!%p742_p4)
}
  0x2b   :  { %s746_s21 = scalar_lea.vmem %s42_s13, 32  ;;  %p751_p6 = scmp.lt.s32.totalorder %s42_s13, %s42_s13 }
  0x2c   :  { %p747_p5 = scmp.ne.s32.totalorder %s42_s13, %s746_s21  ;;  %p752_p7 = scmp.lt.s32.totalorder %s746_s21, %s746_s21 }
  0x2e   :  { %p753_p8 = por %p752_p7, %p751_p6 }
  0x30   :  { %p754_p9 = pnand %p753_p8, %p747_p5 }
  0x32   :  { %757 = shalt.err (!%p754_p9)
}
  0x33   :  { %44 = dma.hbm_to_vmem [thread:$0]  %s870_s2, 32, %s42_s13, [#allocation6]  }
  0x34   :  { %780 = dma.done.wait [#allocation3], 2048  }
  0x35   :  { %781 = vsyncadd [#allocation3], 4294965248 }
  0x36   :  { %782 = dma.done.wait [#allocation6], 32800  }
  0x37   :  { %783 = vsyncadd [#allocation6], 4294934496  ;;  %v79_v0 = vld [vmem:[#allocation5 + $0x8] sm:$0xff]  ;;  %v81_v1 = vld [vmem:[#allocation5 + $0x18] sm:$0xff]  ;;  %s793_s2 = smov [#allocation8]  }
  0x38   :  { %v207_v2 = vld [vmem:[#allocation5 + $0x408] sm:$0xff]  ;;  %v335_v3 = vpack.c.bf16 %v81_v1, %v79_v0  ;;  %v209_v4 = vld [vmem:[#allocation5 + $0x418] sm:$0xff]  ;;  %v78_v5 = vld [vmem:[#allocation5] sm:$0xff]  ;;  %s655_s25 = sshll.u32 %s793_s2, 4  ;;  %s656_s25 = int_to_ptr.vmem [resolvable:$true] %s655_s25 }
  0x39   :  { %v80_v6 = vld [vmem:[#allocation5 + $0x10] sm:$0xff]  ;;  %v399_v7 = vpack.c.bf16 %v209_v4, %v207_v2  ;;  %v206_v9 = vld [vmem:[#allocation5 + $0x400] sm:$0xff]  ;;  %v83_v11 = vld [vmem:[#allocation5 + $0x28] sm:$0xff]  ;;  %s758_s26 = scalar_lea.vmem %s656_s25, 512  ;;  %p763_p11 = scmp.lt.s32.totalorder %s656_s25, %s656_s25 }
  0x3a   :  { %v334_v8 = vpack.c.bf16 %v80_v6, %v78_v5  ;;  %v208_v10 = vld [vmem:[#allocation5 + $0x410] sm:$0xff]  ;;  %474 = vmatprep.subr.bf16.mxu1 %v335_v3  ;;  %v85_v13 = vld [vmem:[#allocation5 + $0x38] sm:$0xff]  ;;  %v211_v14 = vld [vmem:[#allocation5 + $0x428] sm:$0xff]  ;;  %p759_p10 = scmp.ne.s32.totalorder %s656_s25, %s758_s26  ;;  %p764_p12 = scmp.lt.s32.totalorder %s758_s26, %s758_s26 }
  0x3b   :  { %v398_v12 = vpack.c.bf16 %v208_v10, %v206_v9  ;;  %v213_v15 = vld [vmem:[#allocation5 + $0x438] sm:$0xff]  ;;  %560 = vmatprep.subr.bf16.mxu0 %v399_v7  ;;  %v337_v16 = vpack.c.bf16 %v85_v13, %v83_v11  ;;  %v82_v18 = vld [vmem:[#allocation5 + $0x20] sm:$0xff]  ;;  %v84_v19 = vld [vmem:[#allocation5 + $0x30] sm:$0xff] }
  0x3c   :  { %475 = vmatpush1.bf16.msra.mxu1 %v334_v8  ;;  %v401_v17 = vpack.c.bf16 %v213_v15, %v211_v14  ;;  %v210_v20 = vld [vmem:[#allocation5 + $0x420] sm:$0xff]  ;;  %v336_v21 = vpack.c.bf16 %v84_v19, %v82_v18  ;;  %v212_v22 = vld [vmem:[#allocation5 + $0x430] sm:$0xff]  ;;  %v87_v23 = vld [vmem:[#allocation5 + $0x48] sm:$0xff]  ;;  %p765_p13 = por %p764_p12, %p763_p11 }
  0x3d   :  { %561 = vmatpush1.bf16.msra.mxu0 %v398_v12  ;;  %v89_v24 = vld [vmem:[#allocation5 + $0x58] sm:$0xff]  ;;  %476 = vmatprep.subr.bf16.mxu1 %v337_v16  ;;  %v400_v25 = vpack.c.bf16 %v212_v22, %v210_v20  ;;  %v215_v27 = vld [vmem:[#allocation5 + $0x448] sm:$0xff]  ;;  %v86_v29 = vld [vmem:[#allocation5 + $0x40] sm:$0xff] }
  0x3e   :  { %562 = vmatprep.subr.bf16.mxu0 %v401_v17  ;;  %v339_v26 = vpack.c.bf16 %v89_v24, %v87_v23  ;;  %v217_v28 = vld [vmem:[#allocation5 + $0x458] sm:$0xff]  ;;  %v88_v31 = vld [vmem:[#allocation5 + $0x50] sm:$0xff]  ;;  %v214_v32 = vld [vmem:[#allocation5 + $0x440] sm:$0xff]  ;;  %p766_p0 = pnand %p765_p13, %p759_p10 }
  0x3f   :  { %v403_v30 = vpack.c.bf16 %v217_v28, %v215_v27  ;;  %v216_v33 = vld [vmem:[#allocation5 + $0x450] sm:$0xff]  ;;  %v338_v34 = vpack.c.bf16 %v88_v31, %v86_v29  ;;  %v91_v35 = vld [vmem:[#allocation5 + $0x68] sm:$0xff]  ;;  %v93_v36 = vld [vmem:[#allocation5 + $0x78] sm:$0xff] }
  0x40   :  { %477 = vmatpush1.bf16.msra.mxu1 %v336_v21  ;;  %v219_v37 = vld [vmem:[#allocation5 + $0x468] sm:$0xff]  ;;  %v402_v38 = vpack.c.bf16 %v216_v33, %v214_v32  ;;  %v341_v39 = vpack.c.bf16 %v93_v36, %v91_v35  ;;  %v221_v40 = vld [vmem:[#allocation5 + $0x478] sm:$0xff]  ;;  %v90_v41 = vld [vmem:[#allocation5 + $0x60] sm:$0xff] }
  0x41   :  { %563 = vmatpush1.bf16.msra.mxu0 %v400_v25  ;;  %478 = vmatprep.subr.bf16.mxu1 %v339_v26  ;;  %v92_v42 = vld [vmem:[#allocation5 + $0x70] sm:$0xff]  ;;  %v405_v43 = vpack.c.bf16 %v221_v40, %v219_v37  ;;  %v218_v44 = vld [vmem:[#allocation5 + $0x460] sm:$0xff]  ;;  %v95_v46 = vld [vmem:[#allocation5 + $0x88] sm:$0xff] }
  0x42   :  { %564 = vmatprep.subr.bf16.mxu0 %v403_v30  ;;  %v220_v45 = vld [vmem:[#allocation5 + $0x470] sm:$0xff]  ;;  %v97_v47 = vld [vmem:[#allocation5 + $0x98] sm:$0xff]  ;;  %v223_v48 = vld [vmem:[#allocation5 + $0x488] sm:$0xff]  ;;  %v340_v50 = vpack.c.bf16 %v92_v42, %v90_v41 }
  0x43   :  { %v225_v49 = vld [vmem:[#allocation5 + $0x498] sm:$0xff]  ;;  %v404_v51 = vpack.c.bf16 %v220_v45, %v218_v44  ;;  %v343_v52 = vpack.c.bf16 %v97_v47, %v95_v46  ;;  %v94_v53 = vld [vmem:[#allocation5 + $0x80] sm:$0xff]  ;;  %v96_v54 = vld [vmem:[#allocation5 + $0x90] sm:$0xff] }
  0x44   :  { %479 = vmatpush1.bf16.msra.mxu1 %v338_v34  ;;  %v222_v55 = vld [vmem:[#allocation5 + $0x480] sm:$0xff]  ;;  %v407_v56 = vpack.c.bf16 %v225_v49, %v223_v48  ;;  %v224_v57 = vld [vmem:[#allocation5 + $0x490] sm:$0xff]  ;;  %v99_v58 = vld [vmem:[#allocation5 + $0xa8] sm:$0xff]  ;;  %v342_v62 = vpack.c.bf16 %v96_v54, %v94_v53 }
  0x45   :  { %565 = vmatpush1.bf16.msra.mxu0 %v402_v38  ;;  %480 = vmatprep.subr.bf16.mxu1 %v341_v39  ;;  %v101_v59 = vld [vmem:[#allocation5 + $0xb8] sm:$0xff]  ;;  %v227_v60 = vld [vmem:[#allocation5 + $0x4a8] sm:$0xff]  ;;  %v406_v63 = vpack.c.bf16 %v224_v57, %v222_v55  ;;  %v98_v1 = vld [vmem:[#allocation5 + $0xa0] sm:$0xff] }
  0x46   :  { %566 = vmatprep.subr.bf16.mxu0 %v405_v43  ;;  %v229_v61 = vld [vmem:[#allocation5 + $0x4b8] sm:$0xff]  ;;  %v345_v0 = vpack.c.bf16 %v101_v59, %v99_v58  ;;  %v100_v2 = vld [vmem:[#allocation5 + $0xb0] sm:$0xff]  ;;  %v226_v3 = vld [vmem:[#allocation5 + $0x4a0] sm:$0xff] }
  0x47   :  { %v409_v4 = vpack.c.bf16 %v229_v61, %v227_v60  ;;  %v228_v5 = vld [vmem:[#allocation5 + $0x4b0] sm:$0xff]  ;;  %v103_v6 = vld [vmem:[#allocation5 + $0xc8] sm:$0xff]  ;;  %v105_v7 = vld [vmem:[#allocation5 + $0xd8] sm:$0xff]  ;;  %v344_v10 = vpack.c.bf16 %v100_v2, %v98_v1 }
  0x48   :  { %481 = vmatpush1.bf16.msra.mxu1 %v340_v50  ;;  %v231_v8 = vld [vmem:[#allocation5 + $0x4c8] sm:$0xff]  ;;  %v233_v9 = vld [vmem:[#allocation5 + $0x4d8] sm:$0xff]  ;;  %v408_v11 = vpack.c.bf16 %v228_v5, %v226_v3  ;;  %v347_v12 = vpack.c.bf16 %v105_v7, %v103_v6  ;;  %v102_v13 = vld [vmem:[#allocation5 + $0xc0] sm:$0xff] }
  0x49   :  { %567 = vmatpush1.bf16.msra.mxu0 %v404_v51  ;;  %482 = vmatprep.subr.bf16.mxu1 %v343_v52  ;;  %v104_v14 = vld [vmem:[#allocation5 + $0xd0] sm:$0xff]  ;;  %v230_v15 = vld [vmem:[#allocation5 + $0x4c0] sm:$0xff]  ;;  %v411_v16 = vpack.c.bf16 %v233_v9, %v231_v8  ;;  %v107_v18 = vld [vmem:[#allocation5 + $0xe8] sm:$0xff] }
  0x4a   :  { %568 = vmatprep.subr.bf16.mxu0 %v407_v56  ;;  %v232_v17 = vld [vmem:[#allocation5 + $0x4d0] sm:$0xff]  ;;  %v109_v19 = vld [vmem:[#allocation5 + $0xf8] sm:$0xff]  ;;  %v235_v20 = vld [vmem:[#allocation5 + $0x4e8] sm:$0xff]  ;;  %v346_v22 = vpack.c.bf16 %v104_v14, %v102_v13 }
  0x4b   :  { %v237_v21 = vld [vmem:[#allocation5 + $0x4f8] sm:$0xff]  ;;  %v410_v23 = vpack.c.bf16 %v232_v17, %v230_v15  ;;  %v349_v24 = vpack.c.bf16 %v109_v19, %v107_v18  ;;  %v106_v25 = vld [vmem:[#allocation5 + $0xe0] sm:$0xff]  ;;  %v108_v26 = vld [vmem:[#allocation5 + $0xf0] sm:$0xff] }
  0x4c   :  { %483 = vmatpush1.bf16.msra.mxu1 %v342_v62  ;;  %v234_v27 = vld [vmem:[#allocation5 + $0x4e0] sm:$0xff]  ;;  %v413_v28 = vpack.c.bf16 %v237_v21, %v235_v20  ;;  %v236_v29 = vld [vmem:[#allocation5 + $0x4f0] sm:$0xff]  ;;  %v111_v30 = vld [vmem:[#allocation5 + $0x108] sm:$0xff]  ;;  %v348_v34 = vpack.c.bf16 %v108_v26, %v106_v25 }
  0x4d   :  { %569 = vmatpush1.bf16.msra.mxu0 %v406_v63  ;;  %484 = vmatprep.subr.bf16.mxu1 %v345_v0  ;;  %v113_v31 = vld [vmem:[#allocation5 + $0x118] sm:$0xff]  ;;  %v239_v32 = vld [vmem:[#allocation5 + $0x508] sm:$0xff]  ;;  %v412_v35 = vpack.c.bf16 %v236_v29, %v234_v27  ;;  %v110_v37 = vld [vmem:[#allocation5 + $0x100] sm:$0xff] }
  0x4e   :  { %570 = vmatprep.subr.bf16.mxu0 %v409_v4  ;;  %v241_v33 = vld [vmem:[#allocation5 + $0x518] sm:$0xff]  ;;  %v351_v36 = vpack.c.bf16 %v113_v31, %v111_v30  ;;  %v112_v38 = vld [vmem:[#allocation5 + $0x110] sm:$0xff]  ;;  %v238_v39 = vld [vmem:[#allocation5 + $0x500] sm:$0xff] }
  0x4f   :  { %v415_v40 = vpack.c.bf16 %v241_v33, %v239_v32  ;;  %v240_v41 = vld [vmem:[#allocation5 + $0x510] sm:$0xff]  ;;  %v115_v42 = vld [vmem:[#allocation5 + $0x128] sm:$0xff]  ;;  %v117_v43 = vld [vmem:[#allocation5 + $0x138] sm:$0xff]  ;;  %v350_v46 = vpack.c.bf16 %v112_v38, %v110_v37 }
  0x50   :  { %485 = vmatpush1.bf16.msra.mxu1 %v344_v10  ;;  %v243_v44 = vld [vmem:[#allocation5 + $0x528] sm:$0xff]  ;;  %v245_v45 = vld [vmem:[#allocation5 + $0x538] sm:$0xff]  ;;  %v414_v47 = vpack.c.bf16 %v240_v41, %v238_v39  ;;  %v353_v48 = vpack.c.bf16 %v117_v43, %v115_v42  ;;  %v114_v49 = vld [vmem:[#allocation5 + $0x120] sm:$0xff] }
  0x51   :  { %571 = vmatpush1.bf16.msra.mxu0 %v408_v11  ;;  %486 = vmatprep.subr.bf16.mxu1 %v347_v12  ;;  %v116_v50 = vld [vmem:[#allocation5 + $0x130] sm:$0xff]  ;;  %v242_v51 = vld [vmem:[#allocation5 + $0x520] sm:$0xff]  ;;  %v417_v52 = vpack.c.bf16 %v245_v45, %v243_v44  ;;  %v119_v54 = vld [vmem:[#allocation5 + $0x148] sm:$0xff] }
  0x52   :  { %572 = vmatprep.subr.bf16.mxu0 %v411_v16  ;;  %v244_v53 = vld [vmem:[#allocation5 + $0x530] sm:$0xff]  ;;  %v121_v55 = vld [vmem:[#allocation5 + $0x158] sm:$0xff]  ;;  %v247_v56 = vld [vmem:[#allocation5 + $0x548] sm:$0xff]  ;;  %v352_v58 = vpack.c.bf16 %v116_v50, %v114_v49 }
  0x53   :  { %v249_v57 = vld [vmem:[#allocation5 + $0x558] sm:$0xff]  ;;  %v416_v59 = vpack.c.bf16 %v244_v53, %v242_v51  ;;  %v355_v60 = vpack.c.bf16 %v121_v55, %v119_v54  ;;  %v118_v61 = vld [vmem:[#allocation5 + $0x140] sm:$0xff]  ;;  %v120_v62 = vld [vmem:[#allocation5 + $0x150] sm:$0xff] }
  0x54   :  { %487 = vmatpush1.bf16.msra.mxu1 %v346_v22  ;;  %v246_v63 = vld [vmem:[#allocation5 + $0x540] sm:$0xff]  ;;  %v419_v0 = vpack.c.bf16 %v249_v57, %v247_v56  ;;  %v248_v1 = vld [vmem:[#allocation5 + $0x550] sm:$0xff]  ;;  %v123_v2 = vld [vmem:[#allocation5 + $0x168] sm:$0xff]  ;;  %v354_v6 = vpack.c.bf16 %v120_v62, %v118_v61 }
  0x55   :  { %573 = vmatpush1.bf16.msra.mxu0 %v410_v23  ;;  %488 = vmatprep.subr.bf16.mxu1 %v349_v24  ;;  %v125_v3 = vld [vmem:[#allocation5 + $0x178] sm:$0xff]  ;;  %v251_v4 = vld [vmem:[#allocation5 + $0x568] sm:$0xff]  ;;  %v122_v7 = vld [vmem:[#allocation5 + $0x160] sm:$0xff]  ;;  %v418_v8 = vpack.c.bf16 %v248_v1, %v246_v63 }
  0x56   :  { %574 = vmatprep.subr.bf16.mxu0 %v413_v28  ;;  %v253_v5 = vld [vmem:[#allocation5 + $0x578] sm:$0xff]  ;;  %v357_v9 = vpack.c.bf16 %v125_v3, %v123_v2  ;;  %v124_v10 = vld [vmem:[#allocation5 + $0x170] sm:$0xff]  ;;  %v250_v11 = vld [vmem:[#allocation5 + $0x560] sm:$0xff] }
  0x57   :  { %v252_v12 = vld [vmem:[#allocation5 + $0x570] sm:$0xff]  ;;  %v421_v13 = vpack.c.bf16 %v253_v5, %v251_v4  ;;  %v127_v14 = vld [vmem:[#allocation5 + $0x188] sm:$0xff]  ;;  %v129_v15 = vld [vmem:[#allocation5 + $0x198] sm:$0xff]  ;;  %v356_v20 = vpack.c.bf16 %v124_v10, %v122_v7 }
  0x58   :  { %489 = vmatpush1.bf16.msra.mxu1 %v348_v34  ;;  %v55_v16 = vld [vmem:[#allocation2 + $0x8] sm:$0xff]  ;;  %v257_v18 = vld [vmem:[#allocation5 + $0x598] sm:$0xff]  ;;  %v420_v24 = vpack.c.bf16 %v252_v12, %v250_v11  ;;  %v359_v25 = vpack.c.bf16 %v129_v15, %v127_v14  ;;  %v126_v26 = vld [vmem:[#allocation5 + $0x180] sm:$0xff] }
  0x59   :  { %575 = vmatpush1.bf16.msra.mxu0 %v412_v35  ;;  %490 = vmatprep.subr.bf16.mxu1 %v351_v36  ;;  %v255_v17 = vld [vmem:[#allocation5 + $0x588] sm:$0xff]  ;;  %v128_v27 = vld [vmem:[#allocation5 + $0x190] sm:$0xff]  ;;  %v254_v28 = vld [vmem:[#allocation5 + $0x580] sm:$0xff] }
  0x5a   :  { %576 = vmatprep.subr.bf16.mxu0 %v415_v40  ;;  %v63_v19 = vld [vmem:[#allocation2 + $0x48] sm:$0xff]  ;;  %v423_v30 = vpack.c.bf16 %v257_v18, %v255_v17  ;;  %v256_v31 = vld [vmem:[#allocation5 + $0x590] sm:$0xff]  ;;  %v133_v33 = vld [vmem:[#allocation5 + $0x1b8] sm:$0xff]  ;;  %v358_v36 = vpack.c.bf16 %v128_v27, %v126_v26 }
  0x5b   :  { %v71_v21 = vpack.c.bf16 %v63_v19, %v55_v16  ;;  %v59_v22 = vld [vmem:[#allocation2 + $0x28] sm:$0xff]  ;;  %v261_v35 = vld [vmem:[#allocation5 + $0x5b8] sm:$0xff]  ;;  %v422_v37 = vpack.c.bf16 %v256_v31, %v254_v28  ;;  %v130_v39 = vld [vmem:[#allocation5 + $0x1a0] sm:$0xff] }
  0x5c   :  { %491 = vmatpush1.bf16.msra.mxu1 %v350_v46  ;;  %v67_v23 = vld [vmem:[#allocation2 + $0x68] sm:$0xff]  ;;  %v132_v40 = vld [vmem:[#allocation5 + $0x1b0] sm:$0xff]  ;;  %v258_v41 = vld [vmem:[#allocation5 + $0x5a0] sm:$0xff] }
  0x5d   :  { %577 = vmatpush1.bf16.msra.mxu0 %v414_v47  ;;  %492 = vmatprep.subr.bf16.mxu1 %v353_v48  ;;  %v75_v29 = vpack.c.bf16 %v67_v23, %v59_v22  ;;  %v131_v32 = vld [vmem:[#allocation5 + $0x1a8] sm:$0xff]  ;;  %v260_v43 = vld [vmem:[#allocation5 + $0x5b0] sm:$0xff]  ;;  %v137_v45 = vld [vmem:[#allocation5 + $0x1d8] sm:$0xff]  ;;  %v360_v48 = vpack.c.bf16 %v132_v40, %v130_v39 }
  0x5e   :  { %578 = vmatprep.subr.bf16.mxu0 %v417_v52  ;;  %506 = vmatprep.mubr.bf16.mxu1 %v71_v21  ;;  %v259_v34 = vld [vmem:[#allocation5 + $0x5a8] sm:$0xff]  ;;  %v361_v38 = vpack.c.bf16 %v133_v33, %v131_v32  ;;  %v265_v47 = vld [vmem:[#allocation5 + $0x5d8] sm:$0xff]  ;;  %v424_v49 = vpack.c.bf16 %v260_v43, %v258_v41  ;;  %v134_v51 = vld [vmem:[#allocation5 + $0x1c0] sm:$0xff] }
  0x5f   :  { %592 = vmatprep.mubr.bf16.mxu0 %v75_v29  ;;  %v425_v42 = vpack.c.bf16 %v261_v35, %v259_v34  ;;  %v135_v44 = vld [vmem:[#allocation5 + $0x1c8] sm:$0xff]  ;;  %v136_v52 = vld [vmem:[#allocation5 + $0x1d0] sm:$0xff]  ;;  %v262_v53 = vld [vmem:[#allocation5 + $0x5c0] sm:$0xff] }
  0x60   :  { %493 = vmatpush1.bf16.msra.mxu1 %v352_v58  ;;  %v263_v46 = vld [vmem:[#allocation5 + $0x5c8] sm:$0xff]  ;;  %v363_v50 = vpack.c.bf16 %v137_v45, %v135_v44  ;;  %v264_v55 = vld [vmem:[#allocation5 + $0x5d0] sm:$0xff]  ;;  %v141_v57 = vld [vmem:[#allocation5 + $0x1f8] sm:$0xff] }
  0x61   :  { %579 = vmatpush1.bf16.msra.mxu0 %v416_v59  ;;  %494 = vmatprep.subr.bf16.mxu1 %v355_v60  ;;  %v427_v54 = vpack.c.bf16 %v265_v47, %v263_v46  ;;  %v139_v56 = vld [vmem:[#allocation5 + $0x1e8] sm:$0xff]  ;;  %v269_v59 = vld [vmem:[#allocation5 + $0x5f8] sm:$0xff]  ;;  %v362_v60 = vpack.c.bf16 %v136_v52, %v134_v51  ;;  %v426_v61 = vpack.c.bf16 %v264_v55, %v262_v53  ;;  %v138_v63 = vld [vmem:[#allocation5 + $0x1e0] sm:$0xff] }
  0x62   :  { %580 = vmatprep.subr.bf16.mxu0 %v419_v0  ;;  %v267_v58 = vld [vmem:[#allocation5 + $0x5e8] sm:$0xff]  ;;  %v365_v62 = vpack.c.bf16 %v141_v57, %v139_v56  ;;  %v140_v0 = vld [vmem:[#allocation5 + $0x1f0] sm:$0xff]  ;;  %v266_v1 = vld [vmem:[#allocation5 + $0x5e0] sm:$0xff] }
  0x63   :  { %v429_v2 = vpack.c.bf16 %v269_v59, %v267_v58  ;;  %v268_v3 = vld [vmem:[#allocation5 + $0x5f0] sm:$0xff]  ;;  %v143_v4 = vld [vmem:[#allocation5 + $0x208] sm:$0xff]  ;;  %v145_v5 = vld [vmem:[#allocation5 + $0x218] sm:$0xff] }
  0x64   :  { %495 = vmatpush1.bf16.msra.mxu1 %v354_v6  ;;  %v271_v6 = vld [vmem:[#allocation5 + $0x608] sm:$0xff]  ;;  %v273_v7 = vld [vmem:[#allocation5 + $0x618] sm:$0xff]  ;;  %v62_v10 = vld [vmem:[#allocation2 + $0x40] sm:$0xff]  ;;  %v367_v14 = vpack.c.bf16 %v145_v5, %v143_v4 }
  0x65   :  { %581 = vmatpush1.bf16.msra.mxu0 %v418_v8  ;;  %496 = vmatprep.subr.bf16.mxu1 %v357_v9  ;;  %v54_v8 = vld [vmem:[#allocation2] sm:$0xff]  ;;  %v364_v9 = vpack.c.bf16 %v140_v0, %v138_v63  ;;  %v144_v12 = vld [vmem:[#allocation5 + $0x210] sm:$0xff]  ;;  %v431_v18 = vpack.c.bf16 %v273_v7, %v271_v6  ;;  %v149_v21 = vld [vmem:[#allocation5 + $0x238] sm:$0xff] }
  0x66   :  { %582 = vmatprep.subr.bf16.mxu0 %v421_v13  ;;  %v142_v11 = vld [vmem:[#allocation5 + $0x200] sm:$0xff]  ;;  %v428_v13 = vpack.c.bf16 %v268_v3, %v266_v1  ;;  %v272_v19 = vld [vmem:[#allocation5 + $0x610] sm:$0xff]  ;;  %v70_v22 = vpack.c.bf16 %v62_v10, %v54_v8  ;;  %v275_v23 = vld [vmem:[#allocation5 + $0x628] sm:$0xff] }
  0x67   :  { %v58_v15 = vld [vmem:[#allocation2 + $0x20] sm:$0xff]  ;;  %v276_v33 = vld [vmem:[#allocation5 + $0x630] sm:$0xff]  ;;  %v151_v34 = vld [vmem:[#allocation5 + $0x248] sm:$0xff] }
  0x68   :  { %497 = vmatpush1.bf16.msra.mxu1 %v356_v20  ;;  %v66_v16 = vld [vmem:[#allocation2 + $0x60] sm:$0xff]  ;;  %v147_v20 = vld [vmem:[#allocation5 + $0x228] sm:$0xff]  ;;  %v153_v35 = vld [vmem:[#allocation5 + $0x258] sm:$0xff] }
  0x69   :  { %583 = vmatpush1.bf16.msra.mxu0 %v420_v24  ;;  %498 = vmatprep.subr.bf16.mxu1 %v359_v25  ;;  %v270_v17 = vld [vmem:[#allocation5 + $0x600] sm:$0xff]  ;;  %v277_v24 = vld [vmem:[#allocation5 + $0x638] sm:$0xff]  ;;  %v366_v25 = vpack.c.bf16 %v144_v12, %v142_v11  ;;  %v74_v26 = vpack.c.bf16 %v66_v16, %v58_v15  ;;  %v369_v28 = vpack.c.bf16 %v149_v21, %v147_v20  ;;  %v280_v45 = vld [vmem:[#allocation5 + $0x650] sm:$0xff] }
  0x6a   :  { %584 = vmatprep.subr.bf16.mxu0 %v423_v30  ;;  %v430_v27 = vpack.c.bf16 %v272_v19, %v270_v17  ;;  %v146_v29 = vld [vmem:[#allocation5 + $0x220] sm:$0xff]  ;;  %v148_v30 = vld [vmem:[#allocation5 + $0x230] sm:$0xff]  ;;  %v433_v32 = vpack.c.bf16 %v277_v24, %v275_v23  ;;  %v371_v40 = vpack.c.bf16 %v153_v35, %v151_v34  ;;  %v155_v46 = vld [vmem:[#allocation5 + $0x268] sm:$0xff] }
  0x6b   :  { %v274_v31 = vld [vmem:[#allocation5 + $0x620] sm:$0xff]  ;;  %v157_v47 = vld [vmem:[#allocation5 + $0x278] sm:$0xff]  ;;  %v284_v57 = vld [vmem:[#allocation5 + $0x670] sm:$0xff] }
  0x6c   :  { %499 = vmatpush1.bf16.msra.mxu1 %v358_v36  ;;  %v279_v36 = vld [vmem:[#allocation5 + $0x648] sm:$0xff]  ;;  %v432_v39 = vpack.c.bf16 %v276_v33, %v274_v31  ;;  %v150_v41 = vld [vmem:[#allocation5 + $0x240] sm:$0xff]  ;;  %v373_v52 = vpack.c.bf16 %v157_v47, %v155_v46  ;;  %v161_v59 = vld [vmem:[#allocation5 + $0x298] sm:$0xff] }
  0x6d   :  { %585 = vmatpush1.bf16.msra.mxu0 %v422_v37  ;;  %500 = vmatprep.subr.bf16.mxu1 %v361_v38  ;;  %v281_v37 = vld [vmem:[#allocation5 + $0x658] sm:$0xff]  ;;  %v368_v38 = vpack.c.bf16 %v148_v30, %v146_v29  ;;  %v278_v43 = vld [vmem:[#allocation5 + $0x640] sm:$0xff]  ;;  %v159_v58 = vld [vmem:[#allocation5 + $0x288] sm:$0xff] }
  0x6e   :  { %586 = vmatprep.subr.bf16.mxu0 %v425_v42  ;;  %v152_v42 = vld [vmem:[#allocation5 + $0x250] sm:$0xff]  ;;  %v435_v44 = vpack.c.bf16 %v281_v37, %v279_v36  ;;  %v434_v51 = vpack.c.bf16 %v280_v45, %v278_v43  ;;  %v154_v53 = vld [vmem:[#allocation5 + $0x260] sm:$0xff]  ;;  %v375_v0 = vpack.c.bf16 %v161_v59, %v159_v58  ;;  %v163_v6 = vld [vmem:[#allocation5 + $0x2a8] sm:$0xff] }
  0x6f   :  { %v282_v55 = vld [vmem:[#allocation5 + $0x660] sm:$0xff]  ;;  %v288_v5 = vld [vmem:[#allocation5 + $0x690] sm:$0xff]  ;;  %v165_v7 = vld [vmem:[#allocation5 + $0x2b8] sm:$0xff] }
  0x70   :  { %501 = vmatpush1.bf16.msra.mxu1 %v360_v48  ;;  %v283_v48 = vld [vmem:[#allocation5 + $0x668] sm:$0xff]  ;;  %v436_v63 = vpack.c.bf16 %v284_v57, %v282_v55  ;;  %v158_v1 = vld [vmem:[#allocation5 + $0x280] sm:$0xff]  ;;  %v377_v12 = vpack.c.bf16 %v165_v7, %v163_v6  ;;  %v292_v17 = vld [vmem:[#allocation5 + $0x6b0] sm:$0xff] }
  0x71   :  { %587 = vmatpush1.bf16.msra.mxu0 %v424_v49  ;;  %502 = vmatprep.subr.bf16.mxu1 %v363_v50  ;;  %v285_v49 = vld [vmem:[#allocation5 + $0x678] sm:$0xff]  ;;  %v370_v50 = vpack.c.bf16 %v152_v42, %v150_v41  ;;  %v286_v3 = vld [vmem:[#allocation5 + $0x680] sm:$0xff]  ;;  %v291_v8 = vld [vmem:[#allocation5 + $0x6a8] sm:$0xff] }
  0x72   :  { %588 = vmatprep.subr.bf16.mxu0 %v427_v54  ;;  %v156_v54 = vld [vmem:[#allocation5 + $0x270] sm:$0xff]  ;;  %v437_v56 = vpack.c.bf16 %v285_v49, %v283_v48  ;;  %v438_v11 = vpack.c.bf16 %v288_v5, %v286_v3  ;;  %v290_v15 = vld [vmem:[#allocation5 + $0x6a0] sm:$0xff]  ;;  %v169_v19 = vld [vmem:[#allocation5 + $0x2d8] sm:$0xff] }
  0x73   :  { %v295_v20 = vld [vmem:[#allocation5 + $0x6c8] sm:$0xff]  ;;  %v297_v21 = vld [vmem:[#allocation5 + $0x6d8] sm:$0xff]  ;;  %v440_v23 = vpack.c.bf16 %v292_v17, %v290_v15  ;;  %v296_v29 = vld [vmem:[#allocation5 + $0x6d0] sm:$0xff] }
  0x74   :  { %503 = vmatpush1.bf16.msra.mxu1 %v362_v60  ;;  %v287_v60 = vld [vmem:[#allocation5 + $0x688] sm:$0xff]  ;;  %v173_v31 = vld [vmem:[#allocation5 + $0x2f8] sm:$0xff]  ;;  %v170_v34 = vld [vmem:[#allocation5 + $0x2e0] sm:$0xff] }
  0x75   :  { %589 = vmatpush1.bf16.msra.mxu0 %v426_v61  ;;  %504 = vmatprep.subr.bf16.mxu1 %v365_v62  ;;  %v289_v61 = vld [vmem:[#allocation5 + $0x698] sm:$0xff]  ;;  %v372_v62 = vpack.c.bf16 %v156_v54, %v154_v53  ;;  %v171_v30 = vld [vmem:[#allocation5 + $0x2e8] sm:$0xff]  ;;  %v172_v41 = vld [vmem:[#allocation5 + $0x2f0] sm:$0xff] }
  0x76   :  { %590 = vmatprep.subr.bf16.mxu0 %v429_v2  ;;  %v160_v2 = vld [vmem:[#allocation5 + $0x290] sm:$0xff]  ;;  %v439_v4 = vpack.c.bf16 %v289_v61, %v287_v60  ;;  %v301_v33 = vld [vmem:[#allocation5 + $0x6f8] sm:$0xff]  ;;  %v298_v42 = vld [vmem:[#allocation5 + $0x6e0] sm:$0xff] }
  0x77   :  { %v374_v10 = vpack.c.bf16 %v160_v2, %v158_v1  ;;  %v57_v36 = vld [vmem:[#allocation2 + $0x18] sm:$0xff]  ;;  %v300_v46 = vld [vmem:[#allocation5 + $0x6f0] sm:$0xff]  ;;  %v175_v47 = vld [vmem:[#allocation5 + $0x308] sm:$0xff] }
  0x78   :  { %505 = vmatpush1.bf16.msra.mxu1 %v364_v9  ;;  %v293_v9 = vld [vmem:[#allocation5 + $0x6b8] sm:$0xff]  ;;  %v444_v53 = vpack.c.bf16 %v300_v46, %v298_v42  ;;  %v174_v55 = vld [vmem:[#allocation5 + $0x300] sm:$0xff]  ;;  %v304_v59 = vld [vmem:[#allocation5 + $0x710] sm:$0xff] }
  0x79   :  { %591 = vmatpush1.bf16.msra.mxu0 %v428_v13  ;;  %517 = vmatprep.subr.bf16.mxu1 %v367_v14  ;;  %v162_v13 = vld [vmem:[#allocation5 + $0x2a0] sm:$0xff]  ;;  %v164_v14 = vld [vmem:[#allocation5 + $0x2b0] sm:$0xff]  ;;  %v441_v16 = vpack.c.bf16 %v293_v9, %v291_v8  ;;  %v65_v37 = vld [vmem:[#allocation2 + $0x58] sm:$0xff] }
  0x7a   :  { %603 = vmatprep.subr.bf16.mxu0 %v431_v18  ;;  %v167_v18 = vld [vmem:[#allocation5 + $0x2c8] sm:$0xff]  ;;  %v73_v43 = vpack.c.bf16 %v65_v37, %v57_v36  ;;  %v177_v48 = vld [vmem:[#allocation5 + $0x318] sm:$0xff]  ;;  %v302_v57 = vld [vmem:[#allocation5 + $0x700] sm:$0xff] }
  0x7b   :  { %507 = vmatmul.mubr.bf16.vlgmr.msra.gmra.mrb[0].mxu1 %v70_v22  ;;  %v376_v22 = vpack.c.bf16 %v164_v14, %v162_v13  ;;  %v379_v24 = vpack.c.bf16 %v169_v19, %v167_v18  ;;  %v383_v54 = vpack.c.bf16 %v177_v48, %v175_v47  ;;  %v179_v60 = vld [vmem:[#allocation5 + $0x328] sm:$0xff]  ;;  %v181_v61 = vld [vmem:[#allocation5 + $0x338] sm:$0xff]  ;;  %v446_v1 = vpack.c.bf16 %v304_v59, %v302_v57  ;;  %v178_v3 = vld [vmem:[#allocation5 + $0x320] sm:$0xff] }
  0x7c   :  { %518 = vmatpush1.bf16.msra.mxu1 %v366_v25  ;;  %593 = vmatmul.mubr.bf16.vlgmr.msra.gmra.mrb[0].mxu0 %v74_v26  ;;  %v166_v25 = vld [vmem:[#allocation5 + $0x2c0] sm:$0xff]  ;;  %v168_v26 = vld [vmem:[#allocation5 + $0x2d0] sm:$0xff]  ;;  %v385_v2 = vpack.c.bf16 %v181_v61, %v179_v60  ;;  %v183_v8 = vld [vmem:[#allocation5 + $0x348] sm:$0xff] }
  0x7d   :  { %604 = vmatpush1.bf16.msra.mxu0 %v430_v27  ;;  %519 = vmatprep.subr.bf16.mxu1 %v369_v28  ;;  %v294_v27 = vld [vmem:[#allocation5 + $0x6c0] sm:$0xff]  ;;  %v443_v28 = vpack.c.bf16 %v297_v21, %v295_v20  ;;  %v378_v35 = vpack.c.bf16 %v168_v26, %v166_v25  ;;  %v308_v7 = vld [vmem:[#allocation5 + $0x730] sm:$0xff]  ;;  %v185_v9 = vld [vmem:[#allocation5 + $0x358] sm:$0xff] }
  0x7e   :  { %605 = vmatprep.subr.bf16.mxu0 %v433_v32  ;;  %v299_v32 = vld [vmem:[#allocation5 + $0x6e8] sm:$0xff]  ;;  %549 = vmatprep.mubr.bf16.mxu1 %v73_v43  ;;  %v306_v5 = vld [vmem:[#allocation5 + $0x720] sm:$0xff]  ;;  %v387_v14 = vpack.c.bf16 %v185_v9, %v183_v8  ;;  %v312_v19 = vld [vmem:[#allocation5 + $0x750] sm:$0xff] }
  0x7f   :  { %v445_v45 = vpack.c.bf16 %v301_v33, %v299_v32  ;;  %v448_v13 = vpack.c.bf16 %v308_v7, %v306_v5  ;;  %v182_v15 = vld [vmem:[#allocation5 + $0x340] sm:$0xff]  ;;  %v187_v20 = vld [vmem:[#allocation5 + $0x368] sm:$0xff]  ;;  %v189_v21 = vld [vmem:[#allocation5 + $0x378] sm:$0xff] }
  0x80   :  { %520 = vmatpush1.bf16.msra.mxu1 %v368_v38  ;;  %v61_v38 = vld [vmem:[#allocation2 + $0x38] sm:$0xff]  ;;  %v310_v17 = vld [vmem:[#allocation5 + $0x740] sm:$0xff]  ;;  %v389_v26 = vpack.c.bf16 %v189_v21, %v187_v20  ;;  %v191_v32 = vld [vmem:[#allocation5 + $0x388] sm:$0xff] }
  0x81   :  { %606 = vmatpush1.bf16.msra.mxu0 %v432_v39  ;;  %521 = vmatprep.subr.bf16.mxu1 %v371_v40  ;;  %v442_v39 = vpack.c.bf16 %v296_v29, %v294_v27  ;;  %v381_v40 = vpack.c.bf16 %v173_v31, %v171_v30  ;;  %v450_v25 = vpack.c.bf16 %v312_v19, %v310_v17  ;;  %v186_v27 = vld [vmem:[#allocation5 + $0x360] sm:$0xff]  ;;  %v316_v31 = vld [vmem:[#allocation5 + $0x770] sm:$0xff]  ;;  %v193_v33 = vld [vmem:[#allocation5 + $0x398] sm:$0xff] }
  0x82   :  { %607 = vmatprep.subr.bf16.mxu0 %v435_v44  ;;  %v69_v44 = vld [vmem:[#allocation2 + $0x78] sm:$0xff]  ;;  %v314_v29 = vld [vmem:[#allocation5 + $0x760] sm:$0xff]  ;;  %v320_v43 = vld [vmem:[#allocation5 + $0x790] sm:$0xff] }
  0x83   :  { %v77_v49 = vpack.c.bf16 %v69_v44, %v61_v38  ;;  %v452_v37 = vpack.c.bf16 %v316_v31, %v314_v29  ;;  %v391_v38 = vpack.c.bf16 %v193_v33, %v191_v32  ;;  %v195_v44 = vld [vmem:[#allocation5 + $0x3a8] sm:$0xff]  ;;  %v325_v47 = vld [vmem:[#allocation5 + $0x7b8] sm:$0xff]  ;;  %v56_v17 = vld [vmem:[#allocation2 + $0x10] sm:$0xff] }
  0x84   :  { %522 = vmatpush1.bf16.msra.mxu1 %v370_v50  ;;  %v303_v50 = vld [vmem:[#allocation5 + $0x708] sm:$0xff]  ;;  %v201_v57 = vld [vmem:[#allocation5 + $0x3d8] sm:$0xff]  ;;  %v60_v20 = vld [vmem:[#allocation2 + $0x30] sm:$0xff] }
  0x85   :  { %608 = vmatpush1.bf16.msra.mxu0 %v434_v51  ;;  %523 = vmatprep.subr.bf16.mxu1 %v373_v52  ;;  %v305_v51 = vld [vmem:[#allocation5 + $0x718] sm:$0xff]  ;;  %v380_v52 = vpack.c.bf16 %v172_v41, %v170_v34  ;;  %v319_v34 = vld [vmem:[#allocation5 + $0x788] sm:$0xff]  ;;  %v318_v41 = vld [vmem:[#allocation5 + $0x780] sm:$0xff] }
  0x86   :  { %609 = vmatprep.subr.bf16.mxu0 %v437_v56  ;;  %635 = vmatprep.mubr.bf16.mxu0 %v77_v49  ;;  %v176_v56 = vld [vmem:[#allocation5 + $0x310] sm:$0xff]  ;;  %v447_v58 = vpack.c.bf16 %v305_v51, %v303_v50  ;;  %v323_v46 = vld [vmem:[#allocation5 + $0x7a8] sm:$0xff]  ;;  %v454_v49 = vpack.c.bf16 %v320_v43, %v318_v41  ;;  %v194_v51 = vld [vmem:[#allocation5 + $0x3a0] sm:$0xff] }
  0x87   :  { %v329_v59 = vld [vmem:[#allocation5 + $0x7d8] sm:$0xff]  ;;  %v68_v21 = vld [vmem:[#allocation2 + $0x70] sm:$0xff] }
  0x88   :  { %524 = vmatpush1.bf16.msra.mxu1 %v372_v62  ;;  %v307_v62 = vld [vmem:[#allocation5 + $0x728] sm:$0xff]  ;;  %v205_v5 = vld [vmem:[#allocation5 + $0x3f8] sm:$0xff] }
  0x89   :  { %610 = vmatpush1.bf16.msra.mxu0 %v436_v63  ;;  %525 = vmatprep.subr.bf16.mxu1 %v375_v0  ;;  %v309_v63 = vld [vmem:[#allocation5 + $0x738] sm:$0xff]  ;;  %v382_v0 = vpack.c.bf16 %v176_v56, %v174_v55  ;;  %v324_v55 = vld [vmem:[#allocation5 + $0x7b0] sm:$0xff]  ;;  %v199_v56 = vld [vmem:[#allocation5 + $0x3c8] sm:$0xff] }
  0x8a   :  { %611 = vmatprep.subr.bf16.mxu0 %v439_v4  ;;  %v180_v4 = vld [vmem:[#allocation5 + $0x330] sm:$0xff]  ;;  %v449_v6 = vpack.c.bf16 %v309_v63, %v307_v62  ;;  %v395_v62 = vpack.c.bf16 %v201_v57, %v199_v56  ;;  %v198_v63 = vld [vmem:[#allocation5 + $0x3c0] sm:$0xff]  ;;  %v333_v7 = vld [vmem:[#allocation5 + $0x7f8] sm:$0xff] }
  0x8c   :  { %526 = vmatpush1.bf16.msra.mxu1 %v374_v10  ;;  %v311_v10 = vld [vmem:[#allocation5 + $0x748] sm:$0xff] }
  0x8d   :  { %612 = vmatpush1.bf16.msra.mxu0 %v438_v11  ;;  %527 = vmatprep.subr.bf16.mxu1 %v377_v12  ;;  %v313_v11 = vld [vmem:[#allocation5 + $0x758] sm:$0xff]  ;;  %v384_v12 = vpack.c.bf16 %v180_v4, %v178_v3  ;;  %v328_v3 = vld [vmem:[#allocation5 + $0x7d0] sm:$0xff]  ;;  %v203_v4 = vld [vmem:[#allocation5 + $0x3e8] sm:$0xff] }
  0x8e   :  { %613 = vmatprep.subr.bf16.mxu0 %v441_v16  ;;  %v184_v16 = vld [vmem:[#allocation5 + $0x350] sm:$0xff]  ;;  %v451_v18 = vpack.c.bf16 %v313_v11, %v311_v10  ;;  %v397_v10 = vpack.c.bf16 %v205_v5, %v203_v4  ;;  %v202_v11 = vld [vmem:[#allocation5 + $0x3e0] sm:$0xff] }
  0x90   :  { %528 = vmatpush1.bf16.msra.mxu1 %v376_v22  ;;  %v315_v22 = vld [vmem:[#allocation5 + $0x768] sm:$0xff] }
  0x91   :  { %614 = vmatpush1.bf16.msra.mxu0 %v440_v23  ;;  %529 = vmatprep.subr.bf16.mxu1 %v379_v24  ;;  %v317_v23 = vld [vmem:[#allocation5 + $0x778] sm:$0xff]  ;;  %v386_v24 = vpack.c.bf16 %v184_v16, %v182_v15  ;;  %v332_v15 = vld [vmem:[#allocation5 + $0x7f0] sm:$0xff] }
  0x92   :  { %615 = vmatprep.subr.bf16.mxu0 %v443_v28  ;;  %v188_v28 = vld [vmem:[#allocation5 + $0x370] sm:$0xff]  ;;  %v453_v30 = vpack.c.bf16 %v317_v23, %v315_v22  ;;  %v76_v23 = vpack.c.bf16 %v68_v21, %v60_v20 }
  0x93   :  { %v388_v36 = vpack.c.bf16 %v188_v28, %v186_v27  ;;  %v462_v27 = vld [vmem:[#allocation7] sm:$0x3] }
  0x94   :  { %530 = vmatpush1.bf16.msra.mxu1 %v378_v35  ;;  %v321_v35 = vld [vmem:[#allocation5 + $0x798] sm:$0xff] }
  0x95   :  { %616 = vmatpush1.bf16.msra.mxu0 %v442_v39  ;;  %531 = vmatprep.subr.bf16.mxu1 %v381_v40  ;;  %v190_v39 = vld [vmem:[#allocation5 + $0x380] sm:$0xff]  ;;  %v192_v40 = vld [vmem:[#allocation5 + $0x390] sm:$0xff]  ;;  %v455_v42 = vpack.c.bf16 %v321_v35, %v319_v34 }
  0x96   :  { %617 = vmatprep.subr.bf16.mxu0 %v445_v45  ;;  %v197_v45 = vld [vmem:[#allocation5 + $0x3b8] sm:$0xff]  ;;  %v390_v48 = vpack.c.bf16 %v192_v40, %v190_v39 }
  0x97   :  { %v393_v50 = vpack.c.bf16 %v197_v45, %v195_v44 }
  0x98   :  { %532 = vmatpush1.bf16.msra.mxu1 %v380_v52  ;;  %v196_v52 = vld [vmem:[#allocation5 + $0x3b0] sm:$0xff] }
  0x99   :  { %618 = vmatpush1.bf16.msra.mxu0 %v444_v53  ;;  %533 = vmatprep.subr.bf16.mxu1 %v383_v54  ;;  %v322_v53 = vld [vmem:[#allocation5 + $0x7a0] sm:$0xff]  ;;  %v457_v54 = vpack.c.bf16 %v325_v47, %v323_v46  ;;  %v392_v60 = vpack.c.bf16 %v196_v52, %v194_v51 }
  0x9a   :  { %619 = vmatprep.subr.bf16.mxu0 %v447_v58  ;;  %v327_v58 = vld [vmem:[#allocation5 + $0x7c8] sm:$0xff]  ;;  %v456_v61 = vpack.c.bf16 %v324_v55, %v322_v53 }
  0x9c   :  { %534 = vmatpush1.bf16.msra.mxu1 %v382_v0  ;;  %v200_v0 = vld [vmem:[#allocation5 + $0x3d0] sm:$0xff] }
  0x9d   :  { %620 = vmatpush1.bf16.msra.mxu0 %v446_v1  ;;  %535 = vmatprep.subr.bf16.mxu1 %v385_v2  ;;  %v326_v1 = vld [vmem:[#allocation5 + $0x7c0] sm:$0xff]  ;;  %v459_v2 = vpack.c.bf16 %v329_v59, %v327_v58  ;;  %v394_v8 = vpack.c.bf16 %v200_v0, %v198_v63 }
  0x9e   :  { %621 = vmatprep.subr.bf16.mxu0 %v449_v6  ;;  %v331_v6 = vld [vmem:[#allocation5 + $0x7e8] sm:$0xff]  ;;  %v458_v9 = vpack.c.bf16 %v328_v3, %v326_v1 }
  0xa0   :  { %536 = vmatpush1.bf16.msra.mxu1 %v384_v12  ;;  %v204_v12 = vld [vmem:[#allocation5 + $0x3f0] sm:$0xff] }
  0xa1   :  { %622 = vmatpush1.bf16.msra.mxu0 %v448_v13  ;;  %537 = vmatprep.subr.bf16.mxu1 %v387_v14  ;;  %v461_v13 = vpack.c.bf16 %v333_v7, %v331_v6  ;;  %v330_v14 = vld [vmem:[#allocation5 + $0x7e0] sm:$0xff]  ;;  %v396_v16 = vpack.c.bf16 %v204_v12, %v202_v11 }
  0xa2   :  { %623 = vmatprep.subr.bf16.mxu0 %v451_v18  ;;  %v64_v18 = vld [vmem:[#allocation2 + $0x50] sm:$0xff]  ;;  %v460_v19 = vpack.c.bf16 %v332_v15, %v330_v14 }
  0xa3   :  { %v72_v22 = vpack.c.bf16 %v64_v18, %v56_v17 }
  0xa4   :  { %538 = vmatpush1.bf16.msra.mxu1 %v386_v24  ;;  %v464_v24 = vlaneseq }
  0xa5   :  { %624 = vmatpush1.bf16.msra.mxu0 %v450_v25  ;;  %539 = vmatprep.subr.bf16.mxu1 %v389_v26 }
  0xa6   :  { %625 = vmatprep.subr.bf16.mxu0 %v453_v30  ;;  %v465_v25 = vshrl.u32 %v464_v24, 7 }
  0xa8   :  { %540 = vmatpush1.bf16.msra.mxu1 %v388_v36  ;;  %v466_v26 = vsub.s32 0, %v465_v25  ;;  %v470_v28 = vsub.s32 1, %v465_v25 }
  0xa9   :  { %626 = vmatpush1.bf16.msra.mxu0 %v452_v37  ;;  %541 = vmatprep.subr.bf16.mxu1 %v391_v38 }
  0xaa   :  { %627 = vmatprep.subr.bf16.mxu0 %v455_v42  ;;  %v467_v29 = vrot.slane %v462_v27, %v466_v26  ;;  %v471_v30 = vrot.slane %v462_v27, %v470_v28 }
  0xac   :  { %542 = vmatpush1.bf16.msra.mxu1 %v390_v48 }
  0xad   :  { %628 = vmatpush1.bf16.msra.mxu0 %v454_v49  ;;  %543 = vmatprep.subr.bf16.mxu1 %v393_v50 }
  0xae   :  { %629 = vmatprep.subr.bf16.mxu0 %v457_v54 }
  0xb0   :  { %544 = vmatpush1.bf16.msra.mxu1 %v392_v60 }
  0xb1   :  { %630 = vmatpush1.bf16.msra.mxu0 %v456_v61  ;;  %545 = vmatprep.subr.bf16.mxu1 %v395_v62 }
  0xb2   :  { %631 = vmatprep.subr.bf16.mxu0 %v459_v2 }
  0xb4   :  { %546 = vmatpush1.bf16.msra.mxu1 %v394_v8 }
  0xb5   :  { %632 = vmatpush1.bf16.msra.mxu0 %v458_v9  ;;  %547 = vmatprep.subr.bf16.mxu1 %v397_v10 }
  0xb6   :  { %633 = vmatprep.subr.bf16.mxu0 %v461_v13 }
  0xb8   :  { %548 = vmatpush1.bf16.msra.mxu1 %v396_v16 }
  0xb9   :  { %634 = vmatpush1.bf16.msra.mxu0 %v460_v19 }
  0xbb   :  { %550 = vmatmul.mubr.bf16.vlgmr.msra.gmra.mrb[0].mxu1 %v72_v22 }
  0xbc   :  { %636 = vmatmul.mubr.bf16.vlgmr.msra.gmra.mrb[0].mxu0 %v76_v23 }
 0x18e   :  { %v551_v31 = vpop.f32.mrb[0].mxu1 }
 0x18f   :  { %v668_v32 = vadd.f32 %v551_v31, %v467_v29  ;;  %v637_v33 = vpop.f32.mrb[0].mxu0  ;;  %v553_v34 = vpop.f32.mrb[1].mxu1 }
 0x190   :  { %v670_v35 = vadd.f32 %v553_v34, %v471_v30  ;;  %v639_v36 = vpop.f32.mrb[1].mxu0  ;;  %v555_v37 = vpop.f32.mrb[2].mxu1 }
 0x191   :  { %v669_v38 = vadd.f32 %v668_v32, %v637_v33  ;;  %v672_v39 = vadd.f32 %v555_v37, %v467_v29  ;;  %v641_v40 = vpop.f32.mrb[2].mxu0  ;;  %v557_v41 = vpop.f32.mrb[3].mxu1 }
 0x192   :  { %v671_v42 = vadd.f32 %v670_v35, %v639_v36  ;;  %v674_v43 = vadd.f32 %v557_v41, %v471_v30  ;;  %v643_v44 = vpop.f32.mrb[3].mxu0 }
 0x193   :  { %646 = vst [vmem:[#allocation8] sm:$0xff] %v669_v38  ;;  %v673_v45 = vadd.f32 %v672_v39, %v641_v40 }
 0x194   :  { %647 = vst [vmem:[#allocation8 + $0x8] sm:$0xff] %v671_v42  ;;  %v675_v46 = vadd.f32 %v674_v43, %v643_v44 }
 0x195   :  { %648 = vst [vmem:[#allocation8 + $0x10] sm:$0xff] %v673_v45 }
 0x196   :  { %649 = vst [vmem:[#allocation8 + $0x18] sm:$0xff] %v675_v46 }
 0x197   :  { %769 = shalt.err (!%p766_p0)
}
 0x198   :  { %s770_s29 = scalar_lea.hbm %s871_s3, 512 }
 0x199   :  { %p771_p1 = scmp.ne.s32.totalorder %s871_s3, %s770_s29  ;;  %p774_p2 = scmp.lt.u32.totalorder %s770_s29, %s871_s3 }
 0x19b   :  { %p776_p3 = pnand %p774_p2, %p771_p1 }
 0x19d   :  { %779 = shalt.err (!%p776_p3)
}
 0x19e   :  { %661 = dma.vmem_to_hbm [thread:$0]  %s656_s25, 512, %s871_s3, [#allocation4], %s787_s22, %s787_s22, %s788_s23  }
 0x19f   :  { %784 = dma.done.wait [#allocation4], 512  }
 0x1a0   :  { %785 = vsyncadd [#allocation4], 4294966784 }
 0x1a1   :  { %665 = vsyncpa [#allocation3], 1 }
 0x1a2   :  { %666 = vsyncpa [#allocation6], 1 }
 0x1a3   :  { %667 = vsyncpa [#allocation4], 1 }

</bundles_post_ra>
